<compile_context>
chip_gen: v7x
topology: tpu7x:2x2x1
jax: 0.10.0
libtpu: 0.0.40
codegen_flags: <defaults>
</compile_context>

<pallas_src>
import functools

import jax
import jax.numpy as jnp
from jax import lax
from jax.experimental import pallas as pl
from jax.experimental.pallas import tpu as pltpu

_VMEM_LIMIT = 48 * 1024 * 1024  # <= 64 MiB physical on v7x, safe on v5e/v6e


def _pick_tile(dim, pref, align):
    """Largest tile <= pref that evenly divides `dim` and is a multiple of
    `align`; falls back to the full dim (full-extent blocks are always legal)."""
    if dim <= pref:
        return dim
    t = (pref // align) * align
    while t >= align:
        if dim % t == 0:
            return t
        t -= align
    return dim


# ----------------------------------------------------------------------------
# Tiled, pipelined linear kernel (bf16 MXU operands, f32 accumulate)
# ----------------------------------------------------------------------------
def _linear_kernel(x_ref, w_ref, b_ref, o_ref, *, relu):
    y = jnp.dot(x_ref[...].astype(jnp.bfloat16), w_ref[...],
                preferred_element_type=jnp.float32)
    y = y + b_ref[...]
    if relu:
        y = jnp.maximum(y, 0.0)
    o_ref[...] = y


def pallas_linear(x2d, w, b, *, relu=False):
    """(M, K) @ (K, N) + (N,) -> (M, N).

    Tiled over M and N so each tile (plus double buffering) fits VMEM even at
    hidden_size=1024; both grid axes are "parallel" so v7x can shard across
    its two TensorCores.  Weights are cast to bf16 (halves HBM/VMEM bytes and
    uses the fast bf16 MXU path); accumulation stays f32.
    """
    M, K = x2d.shape
    K2, N = w.shape
    assert K == K2
    tm = _pick_tile(M, 512, 8)
    tn = _pick_tile(N, 512, 128)
    kernel = functools.partial(_linear_kernel, relu=relu)
    return pl.pallas_call(
        kernel,
        out_shape=jax.ShapeDtypeStruct((M, N), jnp.float32),
        grid=(M // tm, N // tn),
        in_specs=[
            pl.BlockSpec((tm, K), lambda i, j: (i, 0)),
            pl.BlockSpec((K, tn), lambda i, j: (0, j)),
            pl.BlockSpec((1, tn), lambda i, j: (0, j)),
        ],
        out_specs=pl.BlockSpec((tm, tn), lambda i, j: (i, j)),
        compiler_params=pltpu.CompilerParams(
            dimension_semantics=("parallel", "parallel"),
            vmem_limit_bytes=_VMEM_LIMIT,
        ),
    )(x2d, w.astype(jnp.bfloat16), b.reshape(1, N))


# ----------------------------------------------------------------------------
# Fused bidirectional, time-chunked LSTM recurrence kernel
# ----------------------------------------------------------------------------
def _bilstm_chunk_kernel(xgf_ref, xgb_ref, whf_ref, whb_ref,
                         of_ref, ob_ref,
                         hf, cf, hb, cb, *, H, TC):
    c = pl.program_id(0)

    @pl.when(c == 0)
    def _():
        hf[...] = jnp.zeros_like(hf)
        cf[...] = jnp.zeros_like(cf)
        hb[...] = jnp.zeros_like(hb)
        cb[...] = jnp.zeros_like(cb)

    def cell(gates, h_ref, c_ref):
        # PyTorch gate order: i, f, g, o.  sigmoid/tanh map to the EUP slot,
        # elementwise f32 math stays on the VPU (v5e has no bf16 VPU/EUP).
        i = jax.nn.sigmoid(gates[:, 0 * H:1 * H])
        f = jax.nn.sigmoid(gates[:, 1 * H:2 * H])
        g = jnp.tanh(gates[:, 2 * H:3 * H])
        o = jax.nn.sigmoid(gates[:, 3 * H:4 * H])
        c_new = f * c_ref[...] + i * g
        h_new = o * jnp.tanh(c_new)
        c_ref[...] = c_new
        h_ref[...] = h_new
        return h_new

    def step(k, carry):
        # fwd walks the chunk forwards; bwd walks the (already index_map
        # reversed) chunk backwards so both directions stay in lock-step.
        kb = TC - 1 - k
        gf = xgf_ref[k] + jnp.dot(hf[...].astype(jnp.bfloat16), whf_ref[...],
                                  preferred_element_type=jnp.float32)
        gb = xgb_ref[kb] + jnp.dot(hb[...].astype(jnp.bfloat16), whb_ref[...],
                                   preferred_element_type=jnp.float32)
        of_ref[k] = cell(gf, hf, cf)
        ob_ref[kb] = cell(gb, hb, cb)
        return carry

    lax.fori_loop(0, TC, step, 0, unroll=True)


def pallas_bilstm(xg_fwd, xg_bwd, whh_f, whh_b, *, time_chunk=None):
    """Fused bidirectional LSTM recurrence (time-major).

    xg_fwd, xg_bwd : (T, B, 4H) gate pre-activations (x@W_ih^T + b_ih + b_hh)
                     in ORIGINAL time order for both directions (the bwd
                     reversal happens in the index_maps).
    whh_f, whh_b   : (H, 4H) transposed recurrent weights.
    Returns (h_fwd, h_bwd), each (T, B, H), in original time order.
    """
    T, B, G = xg_fwd.shape
    H = G // 4
    TC = time_chunk if time_chunk is not None else _pick_tile(T, 32, 1)
    assert T % TC == 0
    NC = T // TC
    kernel = functools.partial(_bilstm_chunk_kernel, H=H, TC=TC)
    h_fwd, h_bwd = pl.pallas_call(
        kernel,
        out_shape=(jax.ShapeDtypeStruct((T, B, H), jnp.float32),
                   jax.ShapeDtypeStruct((T, B, H), jnp.float32)),
        grid=(NC,),
        in_specs=[
            pl.BlockSpec((TC, B, G), lambda c: (c, 0, 0)),            # fwd gates
            pl.BlockSpec((TC, B, G), lambda c: (NC - 1 - c, 0, 0)),   # bwd gates (reversed chunks)
            pl.BlockSpec((H, G), lambda c: (0, 0)),                   # W_hh fwd (bf16)
            pl.BlockSpec((H, G), lambda c: (0, 0)),                   # W_hh bwd (bf16)
        ],
        out_specs=[
            pl.BlockSpec((TC, B, H), lambda c: (c, 0, 0)),
            pl.BlockSpec((TC, B, H), lambda c: (NC - 1 - c, 0, 0)),
        ],
        scratch_shapes=[
            pltpu.VMEM((B, H), jnp.float32),  # h fwd
            pltpu.VMEM((B, H), jnp.float32),  # c fwd
            pltpu.VMEM((B, H), jnp.float32),  # h bwd
            pltpu.VMEM((B, H), jnp.float32),  # c bwd
        ],
        compiler_params=pltpu.CompilerParams(
            dimension_semantics=("arbitrary",),   # sequential recurrence
            vmem_limit_bytes=_VMEM_LIMIT,
        ),
    )(xg_fwd, xg_bwd,
      whh_f.astype(jnp.bfloat16), whh_b.astype(jnp.bfloat16))
    return h_fwd, h_bwd


# ----------------------------------------------------------------------------
# Tracker (Linear -> ReLU -> 2-layer biLSTM -> Linear), built from the kernels
# ----------------------------------------------------------------------------
def bilstm_layer_tm(x_tbf, layer_params):
    """x_tbf: (T, B, F_in) time-major -> (T, B, 2H) time-major."""
    T, B, F = x_tbf.shape
    x2d = x_tbf.reshape(T * B, F)
    w_ih_f, b_ih_f, w_hh_f, b_hh_f = layer_params["fwd"]
    w_ih_b, b_ih_b, w_hh_b, b_hh_b = layer_params["bwd"]
    G = w_ih_f.shape[0]                                    # 4H
    # Gate pre-activations computed directly in time-major layout.
    xg_f = pallas_linear(x2d, w_ih_f.T, b_ih_f + b_hh_f).reshape(T, B, G)
    xg_b = pallas_linear(x2d, w_ih_b.T, b_ih_b + b_hh_b).reshape(T, B, G)
    h_f, h_b = pallas_bilstm(xg_f, xg_b, w_hh_f.T, w_hh_b.T)
    return jnp.concatenate([h_f, h_b], axis=-1)            # (T, B, 2H)


def tracker_forward(x_bti, params):
    B, T, F = x_bti.shape
    # Single up-front transpose to time-major; everything downstream stays
    # (T, B, ...) so no per-layer transposes / reversals of large tensors.
    x_tbf = x_bti.transpose(1, 0, 2)
    h = pallas_linear(x_tbf.reshape(T * B, F), params["lin1_w"].T,
                      params["lin1_b"], relu=True)
    h = h.reshape(T, B, -1)
    for layer_params in params["lstm_layers"]:
        h = bilstm_layer_tm(h, layer_params)
    Fh = h.shape[-1]
    out = pallas_linear(h.reshape(T * B, Fh), params["lin2_w"].T,
                        params["lin2_b"])
    return out.reshape(T, B, -1).transpose(1, 0, 2)        # back to (B, T, out)


# ----------------------------------------------------------------------------
# Module_LINet forward (module == 1)
# ----------------------------------------------------------------------------
def module_linet_forward(pc_input, imu_input, imu_acc, params):
    # torch: imu_input.permute(2, 0, 1, 3) -> sensor-major; sensor order is
    # [leftForeArm, rightForeArm, leftLeg, rightLeg, _, _]
    lfa_imu = imu_input[:, :, 0, :]
    rfa_imu = imu_input[:, :, 1, :]
    ll_imu = imu_input[:, :, 2, :]
    rl_imu = imu_input[:, :, 3, :]
    lfa_acc = imu_acc[:, :, 0, :]
    rfa_acc = imu_acc[:, :, 1, :]
    ll_acc = imu_acc[:, :, 2, :]
    rl_acc = imu_acc[:, :, 3, :]

    imu_cat = jnp.concatenate(
        [ll_imu, rl_imu, lfa_imu, rfa_imu, ll_acc, rl_acc, lfa_acc, rfa_acc],
        axis=2,
    )  # (B, T, 48)
    tracker_input = jnp.concatenate([pc_input, imu_cat], axis=2)  # (B, T, 126)

    body_pose = tracker_forward(tracker_input, params["hybrik"])
    return {"body_pose": body_pose}


# ----------------------------------------------------------------------------
# Deterministic parameter construction
# ----------------------------------------------------------------------------
def init_tracker_params(key, input_size, hidden_size, output_size):
    ks = list(jax.random.split(key, 32))
    kidx = [0]

    def nxt():
        k = ks[kidx[0]]
        kidx[0] += 1
        return k

    stdv = 1.0 / jnp.sqrt(jnp.float32(hidden_size))

    def uni(shape):
        return jax.random.uniform(
            nxt(), shape, jnp.float32, minval=-stdv, maxval=stdv
        )

    params = {
        "lin1_w": uni((hidden_size, input_size)),
        "lin1_b": uni((hidden_size,)),
        "lin2_w": uni((output_size, 2 * hidden_size)),
        "lin2_b": uni((output_size,)),
        "lstm_layers": [],
    }
    in_sizes = [hidden_size, 2 * hidden_size]  # 2 stacked biLSTM layers
    for lin in in_sizes:
        layer = {}
        for direction in ("fwd", "bwd"):
            w_ih = uni((4 * hidden_size, lin))
            b_ih = uni((4 * hidden_size,))
            w_hh = uni((4 * hidden_size, hidden_size))
            b_hh = uni((4 * hidden_size,))
            layer[direction] = (w_ih, b_ih, w_hh, b_hh)
        params["lstm_layers"].append(layer)
    return params


# ----------------------------------------------------------------------------
# Main
# ----------------------------------------------------------------------------
if __name__ == "__main__":
    B, T = 2, 8
    IMU = 4                       # number of used IMUs in the feature concat
    HIDDEN = 32                   # small stand-in for hidden_size=1024
    OUTPUT = 24 * 6               # module == 1 output size
    INPUT_SIZE = IMU * 12 + 78    # 126

    key = jax.random.PRNGKey(0)
    k_pc, k_imu, k_acc, k_params = jax.random.split(key, 4)

    pc_input = jax.random.normal(k_pc, (B, T, 78), jnp.float32)
    imu_input = jax.random.normal(k_imu, (B, T, 6, 9), jnp.float32)
    imu_acc = jax.random.normal(k_acc, (B, T, 6, 3), jnp.float32)

    params = {"hybrik": init_tracker_params(k_params, INPUT_SIZE, HIDDEN, OUTPUT)}

    # TODO(synk): Tracker architecture reconstructed (not given in the spec);
    # only module == 1 of Module_LINet is exercised.
    out = module_linet_forward(pc_input, imu_input, imu_acc, params)
    body_pose = jax.block_until_ready(out["body_pose"])

    assert body_pose.shape == (B, T, OUTPUT), body_pose.shape
    assert jnp.all(jnp.isfinite(body_pose))
    print("KERNEL_OK")
</pallas_src>

<mosaic_0001>
module attributes {stable_mosaic.version = 11 : i64} {
  func.func @_linear_kernel(%arg0: i32, %arg1: i32, %arg2: memref<16x126xf32, #tpu.memory_space<vmem>>, %arg3: memref<126x32xbf16, #tpu.memory_space<vmem>>, %arg4: memref<1x32xf32, #tpu.memory_space<vmem>>, %arg5: memref<16x32xf32, #tpu.memory_space<vmem>>) attributes {dimension_semantics = [#tpu.dimension_semantics<parallel>, #tpu.dimension_semantics<parallel>], iteration_bounds = array<i64: 1, 1>, scalar_prefetch = 0 : i64, scratch_operands = 0 : i64, tpu.core_type = #tpu.core_type<tc>, window_params = [{transform_indices = @transform_0, window_bounds = array<i64: 16, 126>}, {transform_indices = @transform_1, window_bounds = array<i64: 126, 32>}, {transform_indices = @transform_2, window_bounds = array<i64: 1, 32>}, {transform_indices = @transform_3, window_bounds = array<i64: 16, 32>}]} {
    %c0 = arith.constant 0 : index
    %c0_0 = arith.constant 0 : index
    %0 = vector.load %arg2[%c0, %c0_0] : memref<16x126xf32, #tpu.memory_space<vmem>>, vector<16x126xf32>
    %1 = arith.truncf %0 : vector<16x126xf32> to vector<16x126xbf16>
    %c0_1 = arith.constant 0 : index
    %c0_2 = arith.constant 0 : index
    %2 = vector.load %arg3[%c0_1, %c0_2] : memref<126x32xbf16, #tpu.memory_space<vmem>>, vector<126x32xbf16>
    %cst = arith.constant dense<0.000000e+00> : vector<16x32xf32>
    %3 = tpu.matmul %1, %2, %cst {dimension_numbers = #tpu.dot_dimension_numbers<[1], [0], [0], [1], [0, 0, 1, 1], [], []>} : vector<16x126xbf16>, vector<126x32xbf16>, vector<16x32xf32> -> vector<16x32xf32>
    %c0_3 = arith.constant 0 : index
    %c0_4 = arith.constant 0 : index
    %4 = vector.load %arg4[%c0_3, %c0_4] : memref<1x32xf32, #tpu.memory_space<vmem>>, vector<1x32xf32>
    %5 = vector.broadcast %4 : vector<1x32xf32> to vector<16x32xf32>
    %6 = arith.addf %3, %5 : vector<16x32xf32>
    %cst_5 = arith.constant 0.000000e+00 : f32
    %7 = vector.broadcast %cst_5 : f32 to vector<16x32xf32>
    %8 = arith.maximumf %6, %7 : vector<16x32xf32>
    %c0_6 = arith.constant 0 : index
    %c0_7 = arith.constant 0 : index
    %9 = vector.load %arg5[%c0_6, %c0_7] : memref<16x32xf32, #tpu.memory_space<vmem>>, vector<16x32xf32>
    tpu.vector_store %arg5[%c0_6, %c0_7], %8 {strides = array<i32>} : memref<16x32xf32, #tpu.memory_space<vmem>>, vector<16x32xf32>,
    return
  }
  func.func @transform_0(%arg0: i32, %arg1: i32) -> (i32, i32) {
    %c0_i32 = arith.constant 0 : i32
    %c0_i32_0 = arith.constant 0 : i32
    return %arg0, %c0_i32 : i32, i32
  }
  func.func @transform_1(%arg0: i32, %arg1: i32) -> (i32, i32) {
    %c0_i32 = arith.constant 0 : i32
    %c0_i32_0 = arith.constant 0 : i32
    return %c0_i32, %arg1 : i32, i32
  }
  func.func @transform_2(%arg0: i32, %arg1: i32) -> (i32, i32) {
    %c0_i32 = arith.constant 0 : i32
    %c0_i32_0 = arith.constant 0 : i32
    return %c0_i32, %arg1 : i32, i32
  }
  func.func @transform_3(%arg0: i32, %arg1: i32) -> (i32, i32) {
    %c0_i32 = arith.constant 0 : i32
    return %arg0, %arg1 : i32, i32
  }
}

</mosaic_0001>

<bundles_post_ra>
// kernel: tpu_custom_call.1
= control target key start
LH: loop header
LB: loop body
LE: loop exit
PB: predicated region body
PF: predicated region fallthrough
CT: control target
= control target key end

     0   :  { %v235_v1 = vmov 0.0   ;;  %vm236_vm0 = vmmov 0   ;;  %s305_s0 = inlined_call_operand.vmem [shape: f32[16,126], index: 0, kind: input, shape index: {}]   ;;  %s306_s1 = inlined_call_operand.vmem [shape: bf16[126,32], index: 1, kind: input, shape index: {}]   ;;  %s307_s2 = inlined_call_operand.vmem [shape: f32[1,32], index: 2, kind: input, shape index: {}]   ;;  %s308_s3 = inlined_call_operand.hbm [shape: f32[16,32], index: 3, kind: output, shape index: {}]  }
   0x1   :  { %v203_v0 = vld [vmem:[%s306_s1] sm:$0xff]   ;;  %178 = vmatprep.subr.bf16.mxu0 %v235_v1  ;;  %v204_v2 = vld [vmem:[%s306_s1 + $0x8] sm:$0xff]   ;;  %194 = vmatprep.mubr.msk.bf16.mxu0 %vm236_vm0, %v235_v1  ;;  %v205_v3 = vld [vmem:[%s306_s1 + $0x10] sm:$0xff]  }
   0x2   :  { %179 = vmatpush3.bf16.msra.mxu0 %v203_v0 }
   0x3   :  { %180 = vmatprep.subr.bf16.mxu0 %v235_v1 }
   0x6   :  { %181 = vmatpush3.bf16.msra.mxu0 %v204_v2 }
   0x7   :  { %182 = vmatprep.subr.bf16.mxu0 %v235_v1 }
   0x8   :  { %8 = vsyncpa [#allocation3], 0  ;;  %v206_v4 = vld [vmem:[%s306_s1 + $0x18] sm:$0xff]   ;;  %v207_v5 = vld [vmem:[%s306_s1 + $0x20] sm:$0xff]   ;;  %vm93_vm1 = vcmask 1046528   ;;  %vm89_vm2 = vcmask 1031168  }
   0x9   :  { %v208_v6 = vld [vmem:[%s306_s1 + $0x28] sm:$0xff]   ;;  %v209_v7 = vld [vmem:[%s306_s1 + $0x30] sm:$0xff]   ;;  %v210_v8 = vld [vmem:[%s306_s1 + $0x38] sm:$0x7f]   ;;  %s237_s1 = smov [#allocation2]   ;;  %vm140_vm3 = vcmask 261120  }
   0xa   :  { %183 = vmatpush3.bf16.msra.mxu0 %v205_v3  ;;  %v16_v9 = vld [vmem:[%s305_s0] sm:$0xff]  ;;  %v17_v10 = vld [vmem:[%s305_s0 + $0x8] sm:$0xff]  ;;  %v95_v11 = vsel %vm93_vm1, %v210_v8, 0  ;;  %s148_s7 = sshll.u32 %s237_s1, 4  ;;  %s149_s7 = int_to_ptr.vmem [resolvable:$true] %s148_s7 }
   0xb   :  { %184 = vmatprep.subr.bf16.mxu0 %v235_v1  ;;  %v18_v12 = vpack.c.bf16 %v17_v10, %v16_v9  ;;  %v159_v13 = vld [vmem:[%s307_s2] ss:$0 sm:$0xff]  ;;  %s211_s0 = scalar_lea.vmem %s149_s7, 256  ;;  %p216_p1 = scmp.lt.s32.totalorder %s149_s7, %s149_s7 }
   0xc   :  { %p212_p0 = scmp.ne.s32.totalorder %s149_s7, %s211_s0  ;;  %p217_p2 = scmp.lt.s32.totalorder %s211_s0, %s211_s0 }
   0xe   :  { %185 = vmatpush3.bf16.msra.mxu0 %v206_v4  ;;  %p218_p3 = por %p217_p2, %p216_p1 }
   0xf   :  { %186 = vmatprep.subr.bf16.mxu0 %v235_v1 }
  0x10   :  { %p219_p4 = pnand %p218_p3, %p212_p0 }
  0x12   :  { %187 = vmatpush3.bf16.msra.mxu0 %v207_v5 }
  0x13   :  { %188 = vmatprep.subr.bf16.mxu0 %v235_v1 }
  0x16   :  { %189 = vmatpush3.bf16.msra.mxu0 %v208_v6 }
  0x17   :  { %190 = vmatprep.subr.bf16.mxu0 %v235_v1 }
  0x1a   :  { %191 = vmatpush3.bf16.msra.mxu0 %v209_v7 }
  0x1b   :  { %192 = vmatprep.subr.bf16.mxu0 %v235_v1 }
  0x1e   :  { %193 = vmatpush3.bf16.msra.mxu0 %v95_v11 }
  0x21   :  { %195 = vmatmul.mubr.msk.bf16.vlgmr.msra.gmra.mrb[0].mxu0 %vm89_vm2, %v18_v12 }
  0xf4   :  { %v131_v14 = vpop.f32.mrb[0].mxu0 }
  0xf5   :  { %v132_v15 = vadd.f32 %v159_v13, %v131_v14  ;;  %v196_v16 = vpop.f32.mrb[1].mxu0 }
  0xf6   :  { %v134_v17 = vpop.f32.mrb[2].mxu0 }
  0xf7   :  { %v138_v18 = vmax.f32 %v132_v15, 0.0  ;;  %v135_v19 = vadd.f32 %v159_v13, %v134_v17  ;;  %v197_v20 = vpop.f32.mrb[3].mxu0 }
  0xf9   :  { %141 = vst.msk [vmem:[#allocation2] sm:$0xff] %vm140_vm3, %v138_v18  ;;  %v139_v21 = vmax.f32 %v135_v19, 0.0 }
  0xfb   :  { %142 = vst.msk [vmem:[#allocation2 + $0x8] sm:$0xff] %vm140_vm3, %v139_v21 }
  0xfc   :  { %222 = shalt.err (!%p219_p4)
}
  0xfd   :  { %s223_s9 = scalar_lea.hbm %s308_s3, 256 }
  0xfe   :  { %p224_p5 = scmp.ne.s32.totalorder %s308_s3, %s223_s9  ;;  %p227_p6 = scmp.lt.u32.totalorder %s223_s9, %s308_s3 }
 0x100   :  { %p229_p7 = pnand %p227_p6, %p224_p5 }
 0x102   :  { %232 = shalt.err (!%p229_p7)
}
 0x103   :  { %s238_s14 = smov 128   ;;  %s239_s15 = smov 8  }
 0x104   :  { %154 = dma.vmem_to_hbm [thread:$0]  %s149_s7, 256, %s308_s3, [#allocation3], %s238_s14, %s238_s14, %s239_s15  }
 0x105   :  { %233 = dma.done.wait [#allocation3], 256  }
 0x106   :  { %234 = vsyncadd [#allocation3], 4294967040 }
 0x107   :  { %158 = vsyncpa [#allocation3], 1 }

</bundles_post_ra>
